<compile_context>
chip_gen: v5e
topology: v5e:2x2
jax: 0.10.0
libtpu: 0.0.40
codegen_flags: <defaults>
</compile_context>

<pallas_src>
import functools
import math

import numpy as np

import jax
import jax.numpy as jnp
from jax.experimental import pallas as pl
from jax.experimental.pallas import tpu as pltpu


_LANE = 128
_SUB = 8


def _round_up(x, m):
    return ((x + m - 1) // m) * m


def _cdiv(a, b):
    return (a + b - 1) // b


# ---------------------------------------------------------------------------
# Host-side planning (all static): per-output-tile input bands, PyTorch
# bilinear align_corners=False / antialias=False convention.
# ---------------------------------------------------------------------------
def _band_plan(out_valid, in_size, tile_out, blk_in):
    """For each output tile, the block-aligned window of input elements that
    feeds it.  Returns (num_tiles, num_blocks, padded_in_size, start_block_tbl)."""
    num_tiles = _cdiv(out_valid, tile_out)
    scale = in_size / out_valid
    firsts, lasts = [], []
    for t in range(num_tiles):
        o_lo = t * tile_out
        o_hi = min((t + 1) * tile_out, out_valid) - 1
        s_lo = max((o_lo + 0.5) * scale - 0.5, 0.0)
        s_hi = max((o_hi + 0.5) * scale - 0.5, 0.0)
        i_lo = min(max(int(math.floor(s_lo)), 0), in_size - 1)
        i_hi = min(int(math.floor(s_hi)) + 1, in_size - 1)
        firsts.append(i_lo)
        lasts.append(i_hi)
    nblk = max(hi // blk_in - lo // blk_in + 1 for lo, hi in zip(firsts, lasts))
    in_pad = blk_in * max(_cdiv(in_size, blk_in), nblk)
    max_start = in_pad // blk_in - nblk
    tbl = np.array([min(lo // blk_in, max_start) for lo in firsts], dtype=np.int32)
    return num_tiles, nblk, in_pad, tbl


def _banded_weights(out_valid, num_tiles, tile_out, in_size, nblk, blk_in,
                    start_blk_tbl, dtype, transpose_last=False):
    """Compact per-tile interpolation weights (2 non-zeros per output sample).

    Returns (num_tiles, nblk, tile_out, blk_in), or with the last two dims
    swapped when transpose_last=True (RHS / width operand)."""
    out_pad = num_tiles * tile_out
    win = nblk * blk_in
    scale = in_size / out_valid
    o = np.arange(out_pad)
    src = np.maximum((o + 0.5) * scale - 0.5, 0.0)
    i0 = np.clip(np.floor(src).astype(np.int64), 0, in_size - 1)
    i1 = np.minimum(i0 + 1, in_size - 1)
    frac = src - i0
    valid = (o < out_valid).astype(np.float64)      # padded output rows -> 0
    tile_idx = o // tile_out
    within = o % tile_out
    win_start = start_blk_tbl[tile_idx].astype(np.int64) * blk_in
    rel0 = np.clip(i0 - win_start, 0, win - 1)
    rel1 = np.clip(i1 - win_start, 0, win - 1)
    w = np.zeros((num_tiles, tile_out, win), dtype=np.float64)
    np.add.at(w, (tile_idx, within, rel0), (1.0 - frac) * valid)
    np.add.at(w, (tile_idx, within, rel1), frac * valid)
    w = w.reshape(num_tiles, tile_out, nblk, blk_in).transpose(0, 2, 1, 3)
    if transpose_last:
        w = w.transpose(0, 1, 3, 2)
    return jnp.asarray(np.ascontiguousarray(w), dtype=dtype)


# ---------------------------------------------------------------------------
# Kernel.  Grid = (h_tiles, w_tiles, row_band_blocks, col_band_blocks).
#   stage 1 (over kb): tmp[c, RBB, TW] += img_band @ Wx_band^T  (C folded into M)
#   stage 2 (per rb, after kb loop): acc[c, TH, TW] += Wy_band @ tmp[c]
#   last (rb, kb): write the output tile.
# ---------------------------------------------------------------------------
def _resize_kernel(row_tbl, col_tbl, img_ref, wy_ref, wx_ref, o_ref,
                   tmp_ref, acc_ref, *, compute_dtype):
    del row_tbl, col_tbl  # only used by the index_maps
    rb = pl.program_id(2)
    kb = pl.program_id(3)
    n_rb = pl.num_programs(2)
    n_kb = pl.num_programs(3)
    c, rbb, kbw = img_ref.shape
    tw = o_ref.shape[2]

    @pl.when(kb == 0)
    def _():
        tmp_ref[...] = jnp.zeros_like(tmp_ref)

    # Stage 1 (width): fold C into M.  RBB % 8 == 0 => reshape is layout-free.
    x = img_ref[...].astype(compute_dtype).reshape(c * rbb, kbw)
    wx = wx_ref[0, 0]                                    # (KB, TW)
    tmp_ref[...] += jnp.dot(
        x, wx, preferred_element_type=jnp.float32).reshape(c, rbb, tw)

    @pl.when(kb == n_kb - 1)
    def _():
        @pl.when(rb == 0)
        def _():
            acc_ref[...] = jnp.zeros_like(acc_ref)

        # Stage 2 (height): small static unroll over channels.
        # TODO(synk): for C >= 16 fold C into the matmul N dim instead.
        wy = wy_ref[0, 0]                                # (TH, RBB)
        t = tmp_ref[...].astype(compute_dtype)           # (C, RBB, TW)
        for ch in range(c):
            acc_ref[ch] += jnp.dot(wy, t[ch], preferred_element_type=jnp.float32)

        @pl.when(rb == n_rb - 1)
        def _():
            o_ref[...] = acc_ref[...].astype(o_ref.dtype)


def scale_image_bilinear(image, factor_ver, factor_hor, *, compute_dtype=None):
    """image: [C, H, W] -> [C, int(H*factor_ver), int(W*factor_hor)]."""
    c, h0, w0 = image.shape
    h1, w1 = int(h0 * factor_ver), int(w0 * factor_hor)   # matches the reference
    if h1 <= 0 or w1 <= 0:
        raise ValueError(f"scaled size is empty: ({h1}, {w1})")

    if not jnp.issubdtype(image.dtype, jnp.floating):
        # TODO(synk): integer image dtypes are computed in f32 (no round-back).
        image = image.astype(jnp.float32)
    out_dtype = image.dtype
    if compute_dtype is None:
        compute_dtype = jnp.bfloat16 if out_dtype == jnp.float32 else out_dtype
    compute_dtype = jnp.dtype(compute_dtype)

    # VMEM budget from the actual part (v5e/v6e 128 MiB, v7x 64 MiB).
    try:
        vmem_cap = int(getattr(pltpu.get_tpu_info(), "vmem_capacity_bytes",
                               64 << 20))
    except Exception:
        vmem_cap = 64 << 20
    vmem_budget = int(vmem_cap * 0.85)

    in_isz = jnp.dtype(image.dtype).itemsize
    w_isz = compute_dtype.itemsize
    out_isz = jnp.dtype(out_dtype).itemsize

    def plan(th, tw):
        eh = _cdiv(th * h0, h1) + 2                       # row band (elements)
        ew = _cdiv(tw * w0, w1) + 2                       # col band (elements)
        rbb = max(_SUB, min(_round_up(eh, _SUB), 256))
        kbw = max(_LANE, min(_round_up(ew, _LANE), 512))
        n_ht, n_rb, h_pad, row_tbl = _band_plan(h1, h0, th, rbb)
        n_wt, n_kb, w_pad, col_tbl = _band_plan(w1, w0, tw, kbw)
        vmem = (2 * c * rbb * kbw * in_isz                # image blocks (x2 buf)
                + 2 * th * rbb * w_isz                    # Wy blocks
                + 2 * kbw * tw * w_isz                    # Wx blocks
                + 2 * c * th * tw * out_isz               # output blocks
                + c * rbb * tw * 4                        # tmp scratch (f32)
                + c * th * tw * 4)                        # acc scratch (f32)
        return dict(th=th, tw=tw, rbb=rbb, kbw=kbw,
                    n_ht=n_ht, n_rb=n_rb, h_pad=h_pad, row_tbl=row_tbl,
                    n_wt=n_wt, n_kb=n_kb, w_pad=w_pad, col_tbl=col_tbl,
                    vmem=vmem)

    # Output tile: lane-dense, and >= 2 grid steps whenever possible (megacore).
    tw = min(_round_up(w1, _LANE), 512)
    th = min(_round_up(h1, _SUB), 256)
    if _cdiv(h1, th) * _cdiv(w1, tw) == 1:
        if w1 > _LANE:
            tw = _round_up(_cdiv(w1, 2), _LANE)
        elif h1 > _SUB:
            th = _round_up(_cdiv(h1, 2), _SUB)
    p = plan(th, tw)
    # Wider lane tile on 128 MiB-VMEM parts for wide outputs.
    if vmem_cap >= (100 << 20) and w1 >= 1024:
        p_big = plan(th, min(_round_up(w1, _LANE), 1024))
        if p_big["vmem"] <= vmem_budget // 2:
            p = p_big
    # Shrink if over budget (TH first — keeps the output lane-dense).
    while p["vmem"] > vmem_budget and (p["th"] > _SUB or p["tw"] > _LANE):
        if p["th"] > _SUB:
            p = plan(max(_SUB, _round_up(p["th"] // 2, _SUB)), p["tw"])
        else:
            p = plan(p["th"], max(_LANE, _round_up(p["tw"] // 2, _LANE)))

    th, tw, rbb, kbw = p["th"], p["tw"], p["rbb"], p["kbw"]
    n_ht, n_rb, h_pad, row_tbl = p["n_ht"], p["n_rb"], p["h_pad"], p["row_tbl"]
    n_wt, n_kb, w_pad, col_tbl = p["n_wt"], p["n_kb"], p["w_pad"], p["col_tbl"]
    h_out_pad, w_out_pad = n_ht * th, n_wt * tw

    img_p = image
    if h_pad != h0 or w_pad != w0:
        img_p = jnp.pad(image, ((0, 0), (0, h_pad - h0), (0, w_pad - w0)))

    wy = _banded_weights(h1, n_ht, th, h0, n_rb, rbb, row_tbl, compute_dtype)
    wx = _banded_weights(w1, n_wt, tw, w0, n_kb, kbw, col_tbl, compute_dtype,
                         transpose_last=True)

    kernel = functools.partial(_resize_kernel, compute_dtype=compute_dtype)
    vmem_limit = int(min(max(p["vmem"] * 5 // 4 + (4 << 20), 32 << 20),
                         vmem_budget))

    out = pl.pallas_call(
        kernel,
        out_shape=jax.ShapeDtypeStruct((c, h_out_pad, w_out_pad), out_dtype),
        grid_spec=pltpu.PrefetchScalarGridSpec(
            num_scalar_prefetch=2,
            grid=(n_ht, n_wt, n_rb, n_kb),
            in_specs=[
                # Image band block: data-dependent block index via prefetch tbls.
                pl.BlockSpec((c, rbb, kbw),
                             lambda i, j, rb, kb, rt, ct: (0, rt[i] + rb, ct[j] + kb)),
                # Compact height weights: (n_ht, n_rb, TH, RBB).
                pl.BlockSpec((1, 1, th, rbb),
                             lambda i, j, rb, kb, rt, ct: (i, rb, 0, 0)),
                # Compact (transposed) width weights: (n_wt, n_kb, KB, TW).
                pl.BlockSpec((1, 1, kbw, tw),
                             lambda i, j, rb, kb, rt, ct: (j, kb, 0, 0)),
            ],
            out_specs=pl.BlockSpec((c, th, tw),
                                   lambda i, j, rb, kb, rt, ct: (0, i, j)),
            scratch_shapes=[pltpu.VMEM((c, rbb, tw), jnp.float32),
                            pltpu.VMEM((c, th, tw), jnp.float32)],
        ),
        compiler_params=pltpu.CompilerParams(
            dimension_semantics=("parallel", "parallel", "arbitrary", "arbitrary"),
            vmem_limit_bytes=vmem_limit,
        ),
    )(jnp.asarray(row_tbl), jnp.asarray(col_tbl), img_p, wy, wx)

    if h_out_pad != h1 or w_out_pad != w1:
        out = out[:, :h1, :w1]
    return out


# ---------------------------------------------------------------------------
# Box scaling: plain JAX (a (N, 4) Pallas tile wastes 124/128 lanes and the
# launch/DMA overhead dwarfs the work; XLA fuses this for free).
# ---------------------------------------------------------------------------
def scale_box(box, factor_ver, factor_hor):
    if not jnp.issubdtype(box.dtype, jnp.floating):
        box = box.astype(jnp.float32)
    scale_vec = jnp.array([factor_hor, factor_ver, factor_hor, factor_ver],
                          dtype=box.dtype)
    # TODO(synk): keep_shape=True clipping / drop_ratio filtering not needed
    # for the defaults (keep_shape=False, drop_ratio=0.0).
    return box * scale_vec


# ---------------------------------------------------------------------------
# Module-equivalent wrapper.
# ---------------------------------------------------------------------------
class ScaleImageBox:
    def __init__(self, factor, keep_shape=False, drop_ratio=0.0,
                 compute_dtype=None):
        if isinstance(factor, (int, float)):
            self.factor_ver = self.factor_hor = float(factor)
        else:
            self.factor_ver, self.factor_hor = float(factor[0]), float(factor[1])
        if self.factor_ver <= 0 or self.factor_hor <= 0:
            raise ValueError("factor values must be > 0")
        # TODO(synk): keep_shape=True constant-padding back to (H, W) not implemented.
        self.keep_shape = keep_shape
        self.drop_ratio = drop_ratio
        self.compute_dtype = compute_dtype

    def __call__(self, image, box):
        assert image.ndim == 3, "reference supports only ndim == 3 (C, H, W)"
        scaled_img = scale_image_bilinear(image, self.factor_ver, self.factor_hor,
                                          compute_dtype=self.compute_dtype)
        scaled_box = scale_box(box, self.factor_ver, self.factor_hor)
        return scaled_img, scaled_box


# ---------------------------------------------------------------------------
# Self-test.
# ---------------------------------------------------------------------------
def _dense_weight_np(out_size, in_size):
    o = np.arange(out_size)
    src = np.maximum((o + 0.5) * (in_size / out_size) - 0.5, 0.0)
    i0 = np.clip(np.floor(src).astype(np.int64), 0, in_size - 1)
    i1 = np.minimum(i0 + 1, in_size - 1)
    frac = src - i0
    w = np.zeros((out_size, in_size), np.float64)
    np.add.at(w, (o, i0), 1.0 - frac)
    np.add.at(w, (o, i1), frac)
    return w


def _dense_ref(img, h_out, w_out):
    img64 = np.asarray(img, np.float64)
    wy = _dense_weight_np(h_out, img64.shape[1])
    wx = _dense_weight_np(w_out, img64.shape[2])
    return jnp.asarray(np.einsum("oh,chw,xw->cox", wy, img64, wx), jnp.float32)


if __name__ == "__main__":
    key = jax.random.PRNGKey(0)
    k_img, k_box, k_wh, k_big, k_wide = jax.random.split(key, 5)

    image = jax.random.uniform(k_img, (3, 16, 16), dtype=jnp.float32)
    xy1 = jax.random.uniform(k_box, (2, 2), dtype=jnp.float32) * 6.0
    wh = jax.random.uniform(k_wh, (2, 2), dtype=jnp.float32) * 6.0 + 1.0
    box = jnp.concatenate([xy1, xy1 + wh], axis=-1)          # (x1, y1, x2, y2)

    # 1) Isotropic upscale, default (bf16 MXU feed, f32 accumulation).
    out_img, out_box = ScaleImageBox(factor=(2.0, 2.0))(image, box)
    jax.block_until_ready(out_img)
    assert out_img.shape == (3, 32, 32), out_img.shape
    assert out_box.shape == (2, 4), out_box.shape
    assert jnp.allclose(out_img, _dense_ref(image, 32, 32), atol=3e-2, rtol=3e-2)
    assert jnp.allclose(out_box, box * jnp.float32(2.0), atol=1e-5)

    # 2) Same in full f32 compute (tighter check of the banded indexing).
    out_img_f32, _ = ScaleImageBox(factor=(2.0, 2.0),
                                   compute_dtype=jnp.float32)(image, box)
    jax.block_until_ready(out_img_f32)
    assert jnp.allclose(out_img_f32, _dense_ref(image, 32, 32),
                        atol=1e-2, rtol=1e-2)

    # 3) Anisotropic upscale.
    out_img2, _ = ScaleImageBox(factor=(2.0, 3.0))(image, box)   # (ver, hor)
    jax.block_until_ready(out_img2)
    assert out_img2.shape == (3, 32, 48), out_img2.shape
    assert jnp.allclose(out_img2, _dense_ref(image, 32, 48), atol=3e-2, rtol=3e-2)

    # 4) Downscale exercising multi-block row-band accumulation (n_rb > 1).
    big = jax.random.uniform(k_big, (3, 64, 64), dtype=jnp.float32)
    out_img3, _ = ScaleImageBox(factor=(0.25, 0.25))(big, box)
    jax.block_until_ready(out_img3)
    assert out_img3.shape == (3, 16, 16), out_img3.shape
    assert jnp.allclose(out_img3, _dense_ref(big, 16, 16), atol=3e-2, rtol=3e-2)

    # 5) Wide image exercising multi-block col-band accumulation (n_kb > 1).
    wide = jax.random.uniform(k_wide, (2, 16, 640), dtype=jnp.float32)
    out_img4, _ = ScaleImageBox(factor=(1.0, 0.4))(wide, box)
    jax.block_until_ready(out_img4)
    assert out_img4.shape == (2, 16, 256), out_img4.shape
    assert jnp.allclose(out_img4, _dense_ref(wide, 16, 256), atol=3e-2, rtol=3e-2)

    print("KERNEL_OK")
</pallas_src>

<mosaic_0001>
module attributes {stable_mosaic.version = 11 : i64} {
  func.func @_resize_kernel(%arg0: i32, %arg1: i32, %arg2: i32, %arg3: i32, %arg4: memref<2xi32, #tpu.memory_space<smem>>, %arg5: memref<1xi32, #tpu.memory_space<smem>>, %arg6: memref<3x16x128xf32, #tpu.memory_space<vmem>>, %arg7: memref<1x1x16x16xbf16, #tpu.memory_space<vmem>>, %arg8: memref<1x1x128x128xbf16, #tpu.memory_space<vmem>>, %arg9: memref<3x16x128xf32, #tpu.memory_space<vmem>>, %arg10: memref<3x16x128xf32, #tpu.memory_space<vmem>>, %arg11: memref<3x16x128xf32, #tpu.memory_space<vmem>>) attributes {dimension_semantics = [#tpu.dimension_semantics<parallel>, #tpu.dimension_semantics<parallel>, #tpu.dimension_semantics<arbitrary>, #tpu.dimension_semantics<arbitrary>], iteration_bounds = array<i64: 2, 1, 1, 1>, scalar_prefetch = 2 : i64, scratch_operands = 2 : i64, tpu.core_type = #tpu.core_type<tc>, window_params = [{transform_indices = @transform_0, window_bounds = array<i64: 3, 16, 128>}, {transform_indices = @transform_1, window_bounds = array<i64: 1, 1, 16, 16>}, {transform_indices = @transform_2, window_bounds = array<i64: 1, 1, 128, 128>}, {transform_indices = @transform_3, window_bounds = array<i64: 3, 16, 128>}]} {
    %c0_i32 = arith.constant 0 : i32
    %0 = arith.cmpi eq, %arg3, %c0_i32 : i32
    %1 = arith.extui %0 : i1 to i32
    %c0_i32_0 = arith.constant 0 : i32
    %2 = arith.cmpi ne, %1, %c0_i32_0 : i32
    scf.if %2 {
      %cst_15 = arith.constant 0.000000e+00 : f32
      %16 = vector.broadcast %cst_15 : f32 to vector<3x16x128xf32>
      %c0_16 = arith.constant 0 : index
      %c0_17 = arith.constant 0 : index
      %c0_18 = arith.constant 0 : index
      %17 = vector.load %arg10[%c0_16, %c0_17, %c0_18] : memref<3x16x128xf32, #tpu.memory_space<vmem>>, vector<3x16x128xf32>
      tpu.vector_store %arg10[%c0_16, %c0_17, %c0_18], %16 {strides = array<i32>} : memref<3x16x128xf32, #tpu.memory_space<vmem>>, vector<3x16x128xf32>,
    } else {
    }
    %c0 = arith.constant 0 : index
    %c0_1 = arith.constant 0 : index
    %c0_2 = arith.constant 0 : index
    %3 = vector.load %arg6[%c0, %c0_1, %c0_2] : memref<3x16x128xf32, #tpu.memory_space<vmem>>, vector<3x16x128xf32>
    %4 = arith.truncf %3 : vector<3x16x128xf32> to vector<3x16x128xbf16>
    %5 = vector.shape_cast %4 : vector<3x16x128xbf16> to vector<48x128xbf16>
    %c0_3 = arith.constant 0 : index
    %c0_4 = arith.constant 0 : index
    %c0_5 = arith.constant 0 : index
    %c0_6 = arith.constant 0 : index
    %6 = vector.load %arg8[%c0_3, %c0_4, %c0_5, %c0_6] : memref<1x1x128x128xbf16, #tpu.memory_space<vmem>>, vector<1x1x128x128xbf16>
    %7 = vector.shape_cast %6 : vector<1x1x128x128xbf16> to vector<128x128xbf16>
    %c0_7 = arith.constant 0 : index
    %c0_8 = arith.constant 0 : index
    %c0_9 = arith.constant 0 : index
    %8 = vector.load %arg10[%c0_7, %c0_8, %c0_9] : memref<3x16x128xf32, #tpu.memory_space<vmem>>, vector<3x16x128xf32>
    %cst = arith.constant dense<0.000000e+00> : vector<48x128xf32>
    %9 = tpu.matmul %5, %7, %cst {dimension_numbers = #tpu.dot_dimension_numbers<[1], [0], [0], [1], [0, 0, 1, 1], [], []>} : vector<48x128xbf16>, vector<128x128xbf16>, vector<48x128xf32> -> vector<48x128xf32>
    %10 = vector.shape_cast %9 : vector<48x128xf32> to vector<3x16x128xf32>
    %11 = arith.addf %8, %10 : vector<3x16x128xf32>
    %c0_10 = arith.constant 0 : index
    %c0_11 = arith.constant 0 : index
    %c0_12 = arith.constant 0 : index
    %12 = vector.load %arg10[%c0_10, %c0_11, %c0_12] : memref<3x16x128xf32, #tpu.memory_space<vmem>>, vector<3x16x128xf32>
    tpu.vector_store %arg10[%c0_10, %c0_11, %c0_12], %11 {strides = array<i32>} : memref<3x16x128xf32, #tpu.memory_space<vmem>>, vector<3x16x128xf32>,
    %c0_i32_13 = arith.constant 0 : i32
    %13 = arith.cmpi eq, %arg3, %c0_i32_13 : i32
    %14 = arith.extui %13 : i1 to i32
    %c0_i32_14 = arith.constant 0 : i32
    %15 = arith.cmpi ne, %14, %c0_i32_14 : i32
    scf.if %15 {
      %c0_i32_15 = arith.constant 0 : i32
      %16 = arith.cmpi eq, %arg2, %c0_i32_15 : i32
      %17 = arith.extui %16 : i1 to i32
      %c0_i32_16 = arith.constant 0 : i32
      %18 = arith.cmpi ne, %17, %c0_i32_16 : i32
      scf.if %18 {
        %cst_45 = arith.constant 0.000000e+00 : f32
        %53 = vector.broadcast %cst_45 : f32 to vector<3x16x128xf32>
        %c0_46 = arith.constant 0 : index
        %c0_47 = arith.constant 0 : index
        %c0_48 = arith.constant 0 : index
        %54 = vector.load %arg11[%c0_46, %c0_47, %c0_48] : memref<3x16x128xf32, #tpu.memory_space<vmem>>, vector<3x16x128xf32>
        tpu.vector_store %arg11[%c0_46, %c0_47, %c0_48], %53 {strides = array<i32>} : memref<3x16x128xf32, #tpu.memory_space<vmem>>, vector<3x16x128xf32>,
      } else {
      }
      %c0_17 = arith.constant 0 : index
      %c0_18 = arith.constant 0 : index
      %c0_19 = arith.constant 0 : index
      %c0_20 = arith.constant 0 : index
      %19 = vector.load %arg7[%c0_17, %c0_18, %c0_19, %c0_20] : memref<1x1x16x16xbf16, #tpu.memory_space<vmem>>, vector<1x1x16x16xbf16>
      %20 = vector.shape_cast %19 : vector<1x1x16x16xbf16> to vector<16x16xbf16>
      %c0_21 = arith.constant 0 : index
      %c0_22 = arith.constant 0 : index
      %c0_23 = arith.constant 0 : index
      %21 = vector.load %arg10[%c0_21, %c0_22, %c0_23] : memref<3x16x128xf32, #tpu.memory_space<vmem>>, vector<3x16x128xf32>
      %22 = arith.truncf %21 : vector<3x16x128xf32> to vector<3x16x128xbf16>
      %c0_24 = arith.constant 0 : index
      %c0_25 = arith.constant 0 : index
      %c0_26 = arith.constant 0 : index
      %23 = vector.load %arg11[%c0_24, %c0_25, %c0_26] : memref<3x16x128xf32, #tpu.memory_space<vmem>>, vector<1x16x128xf32>
      %24 = vector.shape_cast %23 : vector<1x16x128xf32> to vector<16x128xf32>
      %25 = vector.extract_strided_slice %22 {offsets = [0, 0, 0], sizes = [1, 16, 128], strides = [1, 1, 1]} : vector<3x16x128xbf16> to vector<1x16x128xbf16>
      %26 = vector.shape_cast %25 : vector<1x16x128xbf16> to vector<16x128xbf16>
      %cst_27 = arith.constant dense<0.000000e+00> : vector<16x128xf32>
      %27 = tpu.matmul %20, %26, %cst_27 {dimension_numbers = #tpu.dot_dimension_numbers<[1], [0], [0], [1], [0, 0, 1, 1], [], []>} : vector<16x16xbf16>, vector<16x128xbf16>, vector<16x128xf32> -> vector<16x128xf32>
      %28 = arith.addf %24, %27 : vector<16x128xf32>
      %c0_28 = arith.constant 0 : index
      %c0_29 = arith.constant 0 : index
      %c0_30 = arith.constant 0 : index
      %29 = vector.load %arg11[%c0_28, %c0_29, %c0_30] : memref<3x16x128xf32, #tpu.memory_space<vmem>>, vector<1x16x128xf32>
      %30 = vector.shape_cast %29 : vector<1x16x128xf32> to vector<16x128xf32>
      %31 = vector.shape_cast %28 : vector<16x128xf32> to vector<1x16x128xf32>
      tpu.vector_store %arg11[%c0_28, %c0_29, %c0_30], %31 {strides = array<i32>} : memref<3x16x128xf32, #tpu.memory_space<vmem>>, vector<1x16x128xf32>,
      %c1 = arith.constant 1 : index
      %c0_31 = arith.constant 0 : index
      %c0_32 = arith.constant 0 : index
      %32 = vector.load %arg11[%c1, %c0_31, %c0_32] : memref<3x16x128xf32, #tpu.memory_space<vmem>>, vector<1x16x128xf32>
      %33 = vector.shape_cast %32 : vector<1x16x128xf32> to vector<16x128xf32>
      %34 = vector.extract_strided_slice %22 {offsets = [1, 0, 0], sizes = [1, 16, 128], strides = [1, 1, 1]} : vector<3x16x128xbf16> to vector<1x16x128xbf16>
      %35 = vector.shape_cast %34 : vector<1x16x128xbf16> to vector<16x128xbf16>
      %cst_33 = arith.constant dense<0.000000e+00> : vector<16x128xf32>
      %36 = tpu.matmul %20, %35, %cst_33 {dimension_numbers = #tpu.dot_dimension_numbers<[1], [0], [0], [1], [0, 0, 1, 1], [], []>} : vector<16x16xbf16>, vector<16x128xbf16>, vector<16x128xf32> -> vector<16x128xf32>
      %37 = arith.addf %33, %36 : vector<16x128xf32>
      %c1_34 = arith.constant 1 : index
      %c0_35 = arith.constant 0 : index
      %c0_36 = arith.constant 0 : index
      %38 = vector.load %arg11[%c1_34, %c0_35, %c0_36] : memref<3x16x128xf32, #tpu.memory_space<vmem>>, vector<1x16x128xf32>
      %39 = vector.shape_cast %38 : vector<1x16x128xf32> to vector<16x128xf32>
      %40 = vector.shape_cast %37 : vector<16x128xf32> to vector<1x16x128xf32>
      tpu.vector_store %arg11[%c1_34, %c0_35, %c0_36], %40 {strides = array<i32>} : memref<3x16x128xf32, #tpu.memory_space<vmem>>, vector<1x16x128xf32>,
      %c2 = arith.constant 2 : index
      %c0_37 = arith.constant 0 : index
      %c0_38 = arith.constant 0 : index
      %41 = vector.load %arg11[%c2, %c0_37, %c0_38] : memref<3x16x128xf32, #tpu.memory_space<vmem>>, vector<1x16x128xf32>
      %42 = vector.shape_cast %41 : vector<1x16x128xf32> to vector<16x128xf32>
      %43 = vector.extract_strided_slice %22 {offsets = [2, 0, 0], sizes = [1, 16, 128], strides = [1, 1, 1]} : vector<3x16x128xbf16> to vector<1x16x128xbf16>
      %44 = vector.shape_cast %43 : vector<1x16x128xbf16> to vector<16x128xbf16>
      %cst_39 = arith.constant dense<0.000000e+00> : vector<16x128xf32>
      %45 = tpu.matmul %20, %44, %cst_39 {dimension_numbers = #tpu.dot_dimension_numbers<[1], [0], [0], [1], [0, 0, 1, 1], [], []>} : vector<16x16xbf16>, vector<16x128xbf16>, vector<16x128xf32> -> vector<16x128xf32>
      %46 = arith.addf %42, %45 : vector<16x128xf32>
      %c2_40 = arith.constant 2 : index
      %c0_41 = arith.constant 0 : index
      %c0_42 = arith.constant 0 : index
      %47 = vector.load %arg11[%c2_40, %c0_41, %c0_42] : memref<3x16x128xf32, #tpu.memory_space<vmem>>, vector<1x16x128xf32>
      %48 = vector.shape_cast %47 : vector<1x16x128xf32> to vector<16x128xf32>
      %49 = vector.shape_cast %46 : vector<16x128xf32> to vector<1x16x128xf32>
      tpu.vector_store %arg11[%c2_40, %c0_41, %c0_42], %49 {strides = array<i32>} : memref<3x16x128xf32, #tpu.memory_space<vmem>>, vector<1x16x128xf32>,
      %c0_i32_43 = arith.constant 0 : i32
      %50 = arith.cmpi eq, %arg2, %c0_i32_43 : i32
      %51 = arith.extui %50 : i1 to i32
      %c0_i32_44 = arith.constant 0 : i32
      %52 = arith.cmpi ne, %51, %c0_i32_44 : i32
      scf.if %52 {
        %c0_45 = arith.constant 0 : index
        %c0_46 = arith.constant 0 : index
        %c0_47 = arith.constant 0 : index
        %53 = vector.load %arg11[%c0_45, %c0_46, %c0_47] : memref<3x16x128xf32, #tpu.memory_space<vmem>>, vector<3x16x128xf32>
        %c0_48 = arith.constant 0 : index
        %c0_49 = arith.constant 0 : index
        %c0_50 = arith.constant 0 : index
        %54 = vector.load %arg9[%c0_48, %c0_49, %c0_50] : memref<3x16x128xf32, #tpu.memory_space<vmem>>, vector<3x16x128xf32>
        tpu.vector_store %arg9[%c0_48, %c0_49, %c0_50], %53 {strides = array<i32>} : memref<3x16x128xf32, #tpu.memory_space<vmem>>, vector<3x16x128xf32>,
      } else {
      }
    } else {
    }
    return
  }
  func.func @transform_0(%arg0: i32, %arg1: i32, %arg2: i32, %arg3: i32, %arg4: memref<2xi32, #tpu.memory_space<smem>>, %arg5: memref<1xi32, #tpu.memory_space<smem>>) -> (i32, i32, i32) {
    %0 = arith.index_cast %arg0 : i32 to index
    %1 = memref.load %arg4[%0] : memref<2xi32, #tpu.memory_space<smem>>
    %2 = arith.addi %1, %arg2 : i32
    %3 = arith.index_cast %arg1 : i32 to index
    %4 = memref.load %arg5[%3] : memref<1xi32, #tpu.memory_space<smem>>
    %5 = arith.addi %4, %arg3 : i32
    %c0_i32 = arith.constant 0 : i32
    %c0_i32_0 = arith.constant 0 : i32
    return %c0_i32, %2, %5 : i32, i32, i32
  }
  func.func @transform_1(%arg0: i32, %arg1: i32, %arg2: i32, %arg3: i32, %arg4: memref<2xi32, #tpu.memory_space<smem>>, %arg5: memref<1xi32, #tpu.memory_space<smem>>) -> (i32, i32, i32, i32) {
    %c0_i32 = arith.constant 0 : i32
    %c0_i32_0 = arith.constant 0 : i32
    %c0_i32_1 = arith.constant 0 : i32
    return %arg0, %arg2, %c0_i32, %c0_i32_0 : i32, i32, i32, i32
  }
  func.func @transform_2(%arg0: i32, %arg1: i32, %arg2: i32, %arg3: i32, %arg4: memref<2xi32, #tpu.memory_space<smem>>, %arg5: memref<1xi32, #tpu.memory_space<smem>>) -> (i32, i32, i32, i32) {
    %c0_i32 = arith.constant 0 : i32
    %c0_i32_0 = arith.constant 0 : i32
    %c0_i32_1 = arith.constant 0 : i32
    return %arg1, %arg3, %c0_i32, %c0_i32_0 : i32, i32, i32, i32
  }
  func.func @transform_3(%arg0: i32, %arg1: i32, %arg2: i32, %arg3: i32, %arg4: memref<2xi32, #tpu.memory_space<smem>>, %arg5: memref<1xi32, #tpu.memory_space<smem>>) -> (i32, i32, i32) {
    %c0_i32 = arith.constant 0 : i32
    %c0_i32_0 = arith.constant 0 : i32
    return %c0_i32, %arg0, %arg1 : i32, i32, i32
  }
}

</mosaic_0001>

<bundles_post_ra>
// kernel: tpu_custom_call.1
= control target key start
LH: loop header
LB: loop body
LE: loop exit
PB: predicated region body
PF: predicated region fallthrough
CT: control target
= control target key end

     0   :  { %s1162_s23 = smov [#allocation5]   ;;  %s1482_s0 = inlined_call_operand.vmem [shape: s32[2], index: 0, kind: input, shape index: {}]   ;;  %s1483_s1 = inlined_call_operand.<no memory space> [shape: s32[1], index: 1, kind: input, shape index: {}]   ;;  %s1484_s2 = inlined_call_operand.hbm [shape: f32[3,16,128], index: 2, kind: input, shape index: {}]   ;;  %s1485_s3 = inlined_call_operand.hbm [shape: bf16[2,1,16,16], index: 3, kind: input, shape index: {}]   ;;  %s1486_s4 = inlined_call_operand.hbm [shape: bf16[1,1,128,128], index: 4, kind: input, shape index: {}]   ;;  %s1487_s5 = inlined_call_operand.hbm [shape: f32[3,32,128], index: 5, kind: output, shape index: {}]  }
   0x1   :  { %1499 = sst [smem:[#allocation31_spill]] %s1484_s2  ;;  %s11_s20 = sshll.u32 %s1482_s0, 4  ;;  %s12_s20 = int_to_ptr.vmem [resolvable:$true] %s11_s20 }
   0x2   :  { %1500 = sst [smem:[#allocation32_spill]] %s1486_s4 }
   0x3   :  { %1501 = sst [smem:[#allocation33_spill]] %s1487_s5 }
   0x4   :  { %15 = sst [smem:[#allocation6]] %s1483_s1 }
   0x5   :  { %14 = dma.vmem_to_smem %s12_s20, 16, %s1162_s23, [#allocation4] }
   0x6   :  { %1108 = dma.done.wait [#allocation4], 16 }
   0x7   :  { %1109 = vsyncadd [#allocation4], 4294967280 }
   0x8   :  { %18 = sfence }
   0x9   :  { %19 = vsyncpa [#allocation8], 0 }
   0xa   :  { %21 = vsyncpa [#allocation8 + $0x1], 0 }
   0xb   :  { %22 = vsyncpa [#allocation11], 0 }
   0xc   :  { %24 = vsyncpa [#allocation11 + $0x1], 0 }
   0xd   :  { %25 = vsyncpa [#allocation9], 0 }
   0xe   :  { %27 = vsyncpa [#allocation9 + $0x1], 0  ;;  %s1211_s24 = smov 0   ;;  %s1213_s25 = smov 0  }
   0xf   :  { %s1215_s0 = smov 0   ;;  %s1217_s26 = smov 0  }
  0x10   :  { %s1219_s1 = smov 0   ;;  %s1221_s27 = smov 0  }
  0x11   :  { %s1223_s28 = smov 0   ;;  %s1225_s29 = smov 0  }
  0x12   :  { %s1227_s30 = smov 0  }
  0x13 LB: > { %1502 = sst [smem:[#allocation23_spill]] %s1128_s24  ;;  %s1257_s6 = sadd.s32 4294967295, %s1160_s30   ;;  %s1160_s30 = sphi %s1227_s30, %s33_s30   ;;  %s1156_s29 = sphi %s1225_s29, %s1545_s29   ;;  %s1152_s28 = sphi %s1223_s28, %s1544_s28   ;;  %s1148_s27 = sphi %s1221_s27, %s1543_s27   ;;  %s1144_s1 = sphi %s1219_s1, %s1542_s1   ;;  %s1140_s26 = sphi %s1217_s26, %s1541_s26   ;;  %s1136_s0 = sphi %s1215_s0, %s1540_s0   ;;  %s1132_s25 = sphi %s1213_s25, %s1539_s25   ;;  %s1128_s24 = sphi %s1211_s24, %s1538_s24  }
  0x14   : > { %1503 = sst [smem:[#allocation24_spill]] %s1152_s28  ;;  %s777_s7 = sadd.s32 4294967294, %s1160_s30  }
  0x15   : > { %p1497_p0 = scmp.eq.s32.totalorder %s1257_s6, 0  ;;  %p117_p1 = scmp.ne.s32.totalorder %s1132_s25, %s1128_s24 }
  0x16   : > { %p171_p2 = scmp.eq.s32.totalorder %s1257_s6, 1  ;;  %p177_p3 = scmp.eq.s32.totalorder %s777_s7, 1 }
  0x17   : > { %p1266_p4 = por %p117_p1, %p1497_p0  ;;  %p778_p5 = scmp.ge.s32.totalorder %s1160_s30, 1 }
  0x18   : > { %p1271_p6 = por %p177_p3, %p117_p1  ;;  %p184_p7 = scmp.lt.s32.totalorder %s1160_s30, 3 }
  0x19   : > { %s1504_s8 = scalar_select %p1266_p4, 1, 0 }
  0x1a   : > { %s1506_s9 = scalar_select %p1271_p6, 1, 0 }
  0x1b   : > { %1505 = sst [smem:[#allocation25_spill]] %s1504_s8  ;;  %p1279_p8 = pnand %p778_p5, %p184_p7 }
  0x1c   : > { %1507 = sst [smem:[#allocation26_spill]] %s1506_s9  ;;  %s1163_s14 = smov [#allocation12]  }
  0x1d   : > { %s1508_s4 = sld [smem:[#allocation32_spill]]  ;;  %p864_p9 = pneg %p1279_p8 }
  0x1e   : > { %s202_s15 = sshll.u32 %s1163_s14, 4  ;;  %s1488_s16 = smov 64   ;;  %s203_s15 = int_to_ptr.vmem [resolvable:$true] %s202_s15 }
  0x1f   : > { %p865_p10 = pnand %p864_p9, %p1497_p0  ;;  %s1489_s17 = smov 4  }
  0x20   : > { %s59_s18 = sadd.s32 1, %s1156_s29  ;;  %s63_s19 = sld [smem:[#allocation5 + %s1156_s29]] }
  0x21   : > { %p61_p12 = scmp.ge.s32.totalorder %s59_s18, 2  ;;  %s1293_s20 = sld [smem:[#allocation6]] }
  0x22   : > { %s76_s21 = sadd.s32 1, %s1148_s27  ;;  %p83_p13 = scmp.ne.s32.totalorder %s1148_s27, %s1144_s1 }
  0x23   : > { %s200_s12 = sshll.u32 %s1508_s4, 4  ;;  %s1547_s18 = smov (%p61_p12, %s59_s18), 0  ;;  %s201_s12 = int_to_ptr.hbm [resolvable:$true] %s200_s12 }
  0x24   : > { %867 = dma.hbm_to_vmem [thread:$0]  (!%p865_p10), %s201_s12, 1024, %s203_s15, [#allocation11], %s1488_s16, %s1488_s16, %s1489_s17  }
  0x25   : > { %1510 = sst [smem:[#allocation27_spill]] %s1547_s18  ;;  %p84_p1 = scmp.eq.s32.totalorder %s1160_s30, 0 }
  0x26   : > { %s67_s22 = sld [smem:[#allocation5 + %s1547_s18]]  ;;  %p89_p3 = scmp.ne.s32.totalorder %s1144_s1, %s1140_s26 }
  0x27   : > { %p1306_p5 = por %p84_p1, %p83_p13  ;;  %p1498_p7 = scmp.lt.s32.totalorder %s1160_s30, 2 }
  0x28   : > { %p1313_p9 = por %p1497_p0, %p89_p3  ;;  %s1490_s10 = sand.u32 1, %s1148_s27  }
  0x29   : > { %s843_s26 = smul.u32 48, %s1490_s10  ;;  %p1324_p10 = pnand %p1498_p7, %p1306_p5 }
  0x2a   : > { %s848_s12 = scalar_select %p1306_p5, [#allocation5], [#allocation16] }
  0x2b   : > { %s220_s15 = scalar_lea.vmem [#allocation7], %s843_s26  ;;  %p111_p3 = scmp.ne.s32.totalorder %s1136_s0, %s1132_s25 }
  0x2c   : > { %s71_s14 = ssub.s32 %s63_s19, %s67_s22  ;;  %s1330_s16 = sshll.u32 %s220_s15, 4 }
  0x2d   : > { %1514 = sst [smem:[#allocation28_spill]] %s1330_s16  ;;  %p74_p12 = scmp.eq.s32.totalorder %s71_s14, 0 }
  0x2e   : > { %s849_s17 = scalar_select %p1306_p5, %s1156_s29, 0 }
  0x2f   : > { %s1337_s10 = scalar_select %p74_p12, %s1148_s27, %s76_s21  }
  0x30   : > { %s1549_s12 = smov (!%p1498_p7, %s848_s12), [#allocation17]  ;;  %s1551_s17 = smov (!%p1498_p7, %s849_s17), 0 }
  0x31   : > { %1515 = sst [smem:[#allocation29_spill]] %s1337_s10  ;;  %s99_s19 = ssub.s32 %s1156_s29, %s1547_s18 }
  0x32   : > { %s221_s4 = sld [smem:[%s1549_s12 + %s1551_s17]]  ;;  %p102_p13 = scmp.eq.s32.totalorder %s99_s19, 0 }
  0x33   : > { %s104_s22 = sadd.s32 1, %s1136_s0  ;;  %p1353_p11 = por %p111_p3, %p84_p1 }
  0x34   : > { %s1349_s26 = scalar_select %p102_p13, %s1136_s0, %s104_s22  }
  0x35   : > { %p1359_p5 = por %p171_p2, %p111_p3  ;;  %s243_s12 = sand.u32 1, %s1160_s30  }
  0x36   : > { %1516 = sst [smem:[#allocation30_spill]] %s1349_s26  ;;  %s245_s19 = sand.u32 1, %s1136_s0  }
  0x37   : > { %s1519_s2 = sld [smem:[#allocation31_spill]]  ;;  %s783_s10 = sshll.u32 %s245_s19, 3 }
  0x38   : > { %s781_s17 = sshll.u32 %s221_s4, 1  ;;  %s832_s9 = sshll.u32 %s1156_s29, 3 }
  0x39   : > { %s228_s14 = sadd.s32 %s781_s17, %s1293_s20  ;;  %s1520_s24 = sand.u32 1, %s1148_s27  }
  0x3a   : > { %s782_s15 = sshll.u32 %s228_s14, 3  ;;  %s217_s5 = scalar_lea.sflag [#allocation8], %s1520_s24 }
  0x3b   : > { %p1016_p1 = pneg %p1324_p10 }
  0x3d   : > { %s230_s22 = scalar_lea.hbm %s1519_s2, %s782_s15  ;;  %s1019_s17 = scalar_lea.hbm %s1519_s2, 48 }
  0x3e   : > { %s231_s26 = sshll.u32 %s230_s22, 4  ;;  %s232_s26 = int_to_ptr.hbm [resolvable:$true] %s231_s26 }
  0x3f   : > { %s1012_s28 = sshra.s32 %s232_s26, 4  ;;  %s1013_s28 = int_to_ptr.hbm [resolvable:$true] %s1012_s28 }
  0x40   : > { %s1014_s8 = scalar_lea.hbm %s1013_s28, 48  ;;  %p1020_p3 = scmp.lt.s32.totalorder %s1013_s28, %s1519_s2 }
  0x41   : > { %p1015_p2 = scmp.ne.s32.totalorder %s1013_s28, %s1014_s8  ;;  %p1021_p0 = scmp.lt.s32.totalorder %s1019_s17, %s1014_s8 }
  0x43   : > { %p1017_p12 = pnand %p1016_p1, %p1015_p2  ;;  %p1022_p7 = por %p1021_p0, %p1020_p3 }
  0x45   : > { %p1018_p13 = pneg %p1017_p12 }
  0x47   : > { %p1023_p6 = pnand %p1022_p7, %p1018_p13 }
  0x49   : > { %1026 = shalt.err (!%p1023_p6)
}
  0x4a   : > { %s1166_s24 = smov 128   ;;  %s1521_s14 = sld [smem:[#allocation28_spill]] }
  0x4b   : > { %s1167_s15 = smov 8   ;;  %s254_s20 = scalar_lea.hbm %s1485_s3, %s832_s9 }
  0x4c   : > { %s247_s16 = scalar_lea.vmem [#allocation10], %s783_s10  ;;  %s255_s8 = sshll.u32 %s254_s20, 4  ;;  %s256_s8 = int_to_ptr.hbm [resolvable:$true] %s255_s8 }
  0x4d   : > { %s257_s28 = sshll.u32 %s247_s16, 4  ;;  %p1523_p0 = scmp.lt.s32.totalorder %s1160_s30, 2  ;;  %s258_s28 = int_to_ptr.vmem [resolvable:$true] %s257_s28 }
  0x4e   : > { %s244_s17 = scalar_lea.sflag [#allocation11], %s243_s12  ;;  %s1524_s18 = smov 4  }
  0x4f   : > { %p874_p6 = pnand %p1523_p0, %p1353_p11  ;;  %s1525_s2 = smov 64  }
  0x50   : > { %s1522_s19 = int_to_ptr.vmem [resolvable:$true] %s1521_s14  ;;  %269 = sbr.rel (%p1279_p8) target bundleno = 454 (0x1c6), region = 32 }
  0x51   : > { %873 = dma.hbm_to_vmem [thread:$0]  (!%p1324_p10), %s232_s26, 768, %s1522_s19, %s217_s5, %s1166_s24, %s1166_s24, %s1167_s15  }
  0x52   : > { %876 = dma.hbm_to_vmem [thread:$0]  (!%p874_p6), %s256_s8, 128, %s258_s28, %s244_s17, %s1525_s2, %s1525_s2, %s1524_s18  }
  0x53   : > { %s271_s5 = sand.u32 (!%p1279_p8), 1, %s1144_s1  }
  0x54   : > { %s844_s9 = smul.u32 (!%p1279_p8), 48, %s271_s5  ;;  %s272_s10 = scalar_lea.sflag (!%p1279_p8), [#allocation8], %s271_s5 }
  0x56   : > { %s1399_s11 = scalar_lea.vmem [#allocation7], %s844_s9 }
  0x57   : > { %1111 = dma.done.wait (%p1313_p9), %s272_s10, 768  }
  0x58   : > { %1113 = vsyncadd (%p1313_p9), %s272_s10, 4294966528  ;;  %s281_s23 = sand.u32 1, %s1257_s6   ;;  %s1407_s2 = sand.u32 1, %s1132_s25  }
  0x59   : > { %s787_s13 = sshll.u32 %s1407_s2, 3  ;;  %s282_s12 = scalar_lea.sflag [#allocation11], %s281_s23 }
  0x5a   : > { %s1410_s24 = scalar_lea.vmem [#allocation10], %s787_s13 }
  0x5b   : > { %1115 = dma.done.wait (%p1266_p4), %s282_s12, 128  }
  0x5c   : > { %1117 = vsyncadd (%p1266_p4), %s282_s12, 4294967168  ;;  %p1527_p8 = scmp.eq.s32.totalorder %s1257_s6, 0 }
  0x5e   : > { %1119 = dma.done.wait (%p1527_p8), [#allocation11], 1024   ;;  %p1528_p11 = pmov %p1527_p8 }
  0x5f   : > { %v840_v0 = vld [vmem:[#allocation12 + $0x38] sm:$0xff]  ;;  %v839_v1 = vld [vmem:[#allocation12 + $0x30] sm:$0xff]  ;;  %v838_v2 = vld [vmem:[#allocation12 + $0x28] sm:$0xff]  ;;  %vm512_vm0 = vcmask 130048   ;;  %s845_s6 = smul.u32 48, %s1407_s2  ;;  %s604_s14 = scalar_lea.sflag [#allocation9], %s1407_s2 }
  0x60   : > { %1121 = vsyncadd (%p1528_p11), [#allocation11], 4294966272  ;;  %436 = vmatpush.bf16.msra.mxu0 %v840_v0  ;;  %v837_v3 = vld [vmem:[#allocation12 + $0x20] sm:$0xff]  ;;  %v836_v4 = vld [vmem:[#allocation12 + $0x18] sm:$0xff] }
  0x61   : > { %v835_v5 = vld [vmem:[#allocation12 + $0x10] sm:$0xff]  ;;  %v337_v7 = vld [vmem:[%s1399_s11 + $0x8] sm:$0xff]  ;;  %v833_v13 = vld [vmem:[#allocation12] sm:$0xff]  ;;  %s318_s7 = scalar_lea.vmem [#allocation13], %s845_s6 }
  0x62   : > { %v336_v6 = vld [vmem:[%s1399_s11] sm:$0xff]  ;;  %v343_v9 = vpack.c.bf16 %v337_v7, %v337_v7  ;;  %v834_v10 = vld [vmem:[#allocation12 + $0x8] sm:$0xff]  ;;  %v338_v15 = vld [vmem:[%s1399_s11 + $0x10] sm:$0xff] }
  0x63   : > { %v342_v8 = vpack.c.bf16 %v336_v6, %v336_v6  ;;  %v339_v16 = vld [vmem:[%s1399_s11 + $0x18] sm:$0xff]  ;;  %v344_v17 = vpack.c.bf16 %v338_v15, %v338_v15  ;;  %v340_v22 = vld [vmem:[%s1399_s11 + $0x20] sm:$0xff]  ;;  %v341_v23 = vld [vmem:[%s1399_s11 + $0x28] sm:$0xff] }
  0x64   : > { %437 = vmatpush.bf16.msra.mxu0 %v839_v1  ;;  %v377_v12 = vunpack.c.l.b16 %v343_v9  ;;  %v345_v18 = vpack.c.bf16 %v339_v16, %v339_v16  ;;  %v346_v24 = vpack.c.bf16 %v340_v22, %v340_v22  ;;  %v347_v25 = vpack.c.bf16 %v341_v23, %v341_v23  ;;  %v841_v37 = vld [vmem:[%s1410_s24] sm:$0xff] }
  0x65   : > { %v376_v11 = vunpack.c.l.b16 %v342_v8  ;;  %v378_v19 = vunpack.c.l.b16 %v344_v17 }
  0x66   : > { %v379_v20 = vunpack.c.l.b16 %v345_v18  ;;  %v380_v26 = vunpack.c.l.b16 %v346_v24  ;;  %v381_v27 = vunpack.c.l.b16 %v347_v25 }
  0x67   : > { %v382_v14 = vpack.c.b16 %v377_v12, %v376_v11 }
  0x68   : > { %438 = vmatpush.bf16.msra.mxu0 %v838_v2  ;;  %v383_v21 = vpack.c.b16 %v379_v20, %v378_v19  ;;  %v384_v28 = vpack.c.b16 %v381_v27, %v380_v26 }
  0x6c   : > { %439 = vmatpush.bf16.msra.mxu0 %v837_v3 }
  0x70   : > { %440 = vmatpush.bf16.msra.mxu0 %v836_v4 }
  0x74   : > { %441 = vmatpush.bf16.msra.mxu0 %v835_v5 }
  0x78   : > { %442 = vmatpush.bf16.msra.mxu0 %v834_v10 }
  0x7c   : > { %443 = vmatpush.bf16.msra.mxu0 %v833_v13 }
  0x7f   : > { %444 = vmatmul.bf16.vlgmr.msra.gmra.mxu0 %v382_v14 }
  0x8f   : > { %449 = vmatmul.bf16.gmra.mxu0 %v383_v21 }
  0x9f   : > { %454 = vmatmul.bf16.gmra.mxu0 %v384_v28 }
  0xfc   : > { %v445_v29 = vpop.f32.mrf.mxu0 }
  0xfd   : > { %v493_v30 = vpack.c.bf16 %v445_v29, %v445_v29 }
  0xff   : > { %v508_v33 = vunpack.c.l.b16 %v493_v30 }
 0x104   : > { %v447_v31 = vpop.f32.mrf.mxu0 }
 0x105   : > { %v494_v32 = vpack.c.bf16 %v447_v31, %v447_v31 }
 0x107   : > { %v509_v34 = vunpack.c.l.b16 %v494_v32 }
 0x109   : > { %v510_v35 = vpack.c.b16 %v509_v34, %v508_v33 }
 0x10b   : > { %523 = vmatpush.bf16.msra.mxu1 %v510_v35 }
 0x10c   : > { %v450_v36 = vpop.f32.mrf.mxu0 }
 0x10d   : > { %v495_v38 = vpack.c.bf16 %v450_v36, %v450_v36 }
 0x10e   : > { %825 = vmatmul.msk.bf16.vlgmr.msra.gmra.mxu1 %vm512_vm0, %v841_v37 }
 0x10f   : > { %v539_v41 = vunpack.c.l.b16 %v495_v38 }
 0x114   : > { %v452_v39 = vpop.f32.mrf.mxu0 }
 0x115   : > { %v496_v40 = vpack.c.bf16 %v452_v39, %v452_v39 }
 0x117   : > { %v540_v42 = vunpack.c.l.b16 %v496_v40 }
 0x119   : > { %v541_v43 = vpack.c.b16 %v540_v42, %v539_v41 }
 0x11b   : > { %550 = vmatpush.bf16.msra.mxu2 %v541_v43 }
 0x11c   : > { %v455_v44 = vpop.f32.mrf.mxu0 }
 0x11d   : > { %v497_v45 = vpack.c.bf16 %v455_v44, %v455_v44 }
 0x11e   : > { %826 = vmatmul.msk.bf16.vlgmr.msra.gmra.mxu2 %vm512_vm0, %v841_v37 }
 0x11f   : > { %v566_v48 = vunpack.c.l.b16 %v497_v45 }
 0x124   : > { %v457_v46 = vpop.f32.mrf.mxu0 }
 0x125   : > { %v498_v47 = vpack.c.bf16 %v457_v46, %v457_v46 }
 0x127   : > { %v567_v49 = vunpack.c.l.b16 %v498_v47 }
 0x129   : > { %v568_v50 = vpack.c.b16 %v567_v49, %v566_v48 }
 0x12b   : > { %577 = vmatpush.bf16.msra.mxu3 %v568_v50 }
 0x12e   : > { %827 = vmatmul.msk.bf16.vlgmr.msra.gmra.mxu3 %vm512_vm0, %v841_v37 }
 0x18b   : > { %v525_v51 = vpop.f32.mrf.mxu1 }
 0x18c   : > { %597 = vst [vmem:[%s318_s7] sm:$0xff] %v525_v51 }
 0x193   : > { %v527_v52 = vpop.f32.mrf.mxu1 }
 0x194   : > { %598 = vst [vmem:[%s318_s7 + $0x8] sm:$0xff] %v527_v52 }
 0x1a1   : > { %v552_v53 = vpop.f32.mrf.mxu2 }
 0x1a2   : > { %599 = vst [vmem:[%s318_s7 + $0x10] sm:$0xff] %v552_v53 }
 0x1a9   : > { %v554_v54 = vpop.f32.mrf.mxu2 }
 0x1aa   : > { %600 = vst [vmem:[%s318_s7 + $0x18] sm:$0xff] %v554_v54 }
 0x1b1   : > { %v579_v55 = vpop.f32.mrf.mxu3 }
 0x1b2   : > { %601 = vst [vmem:[%s318_s7 + $0x20] sm:$0xff] %v579_v55 }
 0x1b9   : > { %v581_v56 = vpop.f32.mrf.mxu3 }
 0x1ba   : > { %602 = vst [vmem:[%s318_s7 + $0x28] sm:$0xff] %v581_v56 }
 0x1bb   : > { %s1529_s15 = sld [smem:[#allocation24_spill]]  ;;  %s627_s22 = sshll.u32 %s318_s7, 4  ;;  %s628_s22 = int_to_ptr.vmem [resolvable:$true] %s627_s22 }
 0x1bc   : > { %s1530_s16 = sld [smem:[#allocation33_spill]]  ;;  %s1168_s17 = smov 256  }
 0x1bd   : > { %856 = sst [smem:[#allocation15]] (%p1359_p5), %s1168_s17  ;;  %s1169_s18 = smov 512  }
 0x1be   : > { %857 = sst [smem:[#allocation15 + $0x1]] (%p1359_p5), %s1169_s18  ;;  %s1170_s5 = smov 2  }
 0x1bf   : > { %858 = sst [smem:[#allocation15 + $0x2]] (%p1359_p5), %s1170_s5  ;;  %s1171_s9 = smov 128  }
 0x1c0   : > { %859 = sst [smem:[#allocation15 + $0x3]] (%p1359_p5), %s1171_s9  ;;  %s1172_s10 = smov 8  }
 0x1c1   : > { %s842_s19 = sshll.u32 %s1529_s15, 4  ;;  %860 = sst [smem:[#allocation15 + $0x4]] (%p1359_p5), %s1171_s9 }
 0x1c2   : > { %s616_s28 = scalar_lea.hbm %s1530_s16, %s842_s19  ;;  %861 = sst [smem:[#allocation15 + $0x5]] (%p1359_p5), %s1172_s10 }
 0x1c3   : > { %s629_s8 = sshll.u32 %s616_s28, 4  ;;  %s1173_s11 = smov [#allocation14]   ;;  %s630_s8 = int_to_ptr.hbm [resolvable:$true] %s629_s8 }
 0x1c4   : > { %s1174_s26 = smov 0  }
 0x1c5   : > { %862 = dma.general (%p1359_p5), %s628_s22, 768, %s630_s8, %s604_s14, %s1173_s11, [#allocation15], %s1174_s26, 0  }
 0x1c6 PF: > { %s1531_s23 = sld [smem:[#allocation23_spill]]  ;;  %p1534_p7 = scmp.ge.s32.totalorder %s1160_s30, 2 }
 0x1c7   : > { %s1532_s2 = sld [smem:[#allocation26_spill]] }
 0x1cc   : > { %s657_s13 = sand.u32 1, %s1531_s23  }
 0x1cd   : > { %p1533_p4 = scmp.ne.s32.totalorder %s1532_s2, 0  ;;  %s658_s12 = scalar_lea.sflag [#allocation9], %s657_s13 }
 0x1cf   : > { %p878_p9 = pnand %p1534_p7, %p1533_p4 }
 0x1d1   : > { %p879_p10 = pneg %p878_p9 }
 0x1d3   : > { %1123 = dma.done.wait (%p879_p10), %s658_s12, 768  }
 0x1d4   : > { %1125 = vsyncadd (%p879_p10), %s658_s12, 4294966528  ;;  %s33_s30 = sadd.s32 1, %s1160_s30   ;;  %s1535_s6 = sld [smem:[#allocation30_spill]] }
 0x1d5   : > { %p30_p2 = scmp.ge.s32.totalorder %s33_s30, 4   ;;  %s1536_s21 = sld [smem:[#allocation29_spill]] }
 0x1d6   : > { %s1537_s7 = sld [smem:[#allocation27_spill]]  ;;  %s1538_s24 = smov %s1132_s25 }
 0x1d7   : > { %s1539_s25 = smov %s1136_s0  ;;  %s1541_s26 = smov %s1144_s1 }
 0x1d8   : > { %s1542_s1 = smov %s1148_s27  ;;  %s1544_s28 = smov %s1156_s29 }
 0x1d9   :  { %32 = sbr.rel (!%p30_p2) target bundleno = 19 (0x13), region = 118 }
 0x1da   : > { %s1540_s0 = smov %s1535_s6 }
 0x1db   : > { %s1543_s27 = smov %s1536_s21 }
 0x1dc   : > { %s1545_s29 = smov %s1537_s7 }
 0x1de   :  { %664 = vsyncpa [#allocation8], 1 }
 0x1df   :  { %666 = vsyncpa [#allocation8 + $0x1], 1 }
 0x1e0   :  { %667 = vsyncpa [#allocation11], 1 }
 0x1e1   :  { %669 = vsyncpa [#allocation11 + $0x1], 1 }
 0x1e2   :  { %670 = vsyncpa [#allocation9], 1 }
 0x1e3   :  { %672 = vsyncpa [#allocation9 + $0x1], 1 }

</bundles_post_ra>
